<compile_context>
chip_gen: v6e
topology: v6e:2x2x1
jax: 0.10.0
libtpu: 0.0.40
codegen_flags: <defaults>
</compile_context>

<pallas_src>
import functools

import jax
import jax.numpy as jnp
from jax import lax
from jax.experimental import pallas as pl
from jax.experimental.pallas import tpu as pltpu


def _round_up(x, m):
    return ((x + m - 1) // m) * m


def _sublane_multiple(dtype):
    # f32 -> 8, bf16/f16 -> 16, int8/fp8 -> 32 (packed sublane granularity).
    return max(8, 32 // jnp.dtype(dtype).itemsize)


def _to_lane_dense(x, rows):
    """Contiguous reshape to (rows, 128); minimal zero-pad only if ragged."""
    flat = x.reshape(-1)
    pad = rows * 128 - flat.shape[0]
    if pad:  # only for sizes not divisible by 128 * sublane-multiple
        flat = jnp.pad(flat, (0, pad))
    return flat.reshape(rows, 128)


def _partial_sums_kernel(yp_ref, yt_ref, ps_ref, ts_ref, out_ref, *,
                         rows, tile, steps, need_mask):
    """Accumulates per-core partial sums of (y_pred-y_true)^2, p*t, p+t.

    out_ref block: (1, 3, 8, 128) f32, resident across the 'arbitrary' axis:
      [0,0] -> sum((y_pred - y_true)^2)     (as an (8,128) partial block)
      [0,1] -> sum(y_pred_seg * y_true_seg)
      [0,2] -> sum(y_pred_seg) + sum(y_true_seg)
    """
    c = pl.program_id(0)   # core / partial-output index ("parallel")
    i = pl.program_id(1)   # streaming step          ("arbitrary")

    @pl.when(i == 0)
    def _():
        out_ref[...] = jnp.zeros_like(out_ref)

    g = tile // 8
    yp = yp_ref[...].astype(jnp.float32).reshape(g, 8, 128)
    yt = yt_ref[...].astype(jnp.float32).reshape(g, 8, 128)
    ps = ps_ref[...].astype(jnp.float32).reshape(g, 8, 128)
    ts = ts_ref[...].astype(jnp.float32).reshape(g, 8, 128)

    diff = yp - yt
    sq = diff * diff
    inter = ps * ts
    den = ps + ts

    if need_mask:
        # Mask rows beyond the valid range (ragged last block and/or the
        # clamped duplicate block an over-covering core re-reads).
        intended = c * steps + i                 # intended block index
        valid = rows - intended * tile           # valid rows in this block
        row = (lax.broadcasted_iota(jnp.int32, (g, 8, 128), 0) * 8
               + lax.broadcasted_iota(jnp.int32, (g, 8, 128), 1))
        m = row < valid
        zero = jnp.float32(0.0)
        sq = jnp.where(m, sq, zero)
        inter = jnp.where(m, inter, zero)
        den = jnp.where(m, den, zero)

    # One (8,128) accumulate per term per grid step (3 vst / step total).
    out_ref[0, 0, :, :] += jnp.sum(sq, axis=0)
    out_ref[0, 1, :, :] += jnp.sum(inter, axis=0)
    out_ref[0, 2, :, :] += jnp.sum(den, axis=0)


def combined_loss(y_pred, y_true, y_pred_seg, y_true_seg, displacement,
                  image_weight=0.5, segmentation_weight=0.5,
                  displacement_weight=0.5, dice_eps=1e-5, tile_rows=2048):
    assert y_pred.shape == y_true.shape == y_pred_seg.shape == y_true_seg.shape

    total = int(y_pred.size)
    inputs = (y_pred, y_true, y_pred_seg, y_true_seg)
    mult = max(_sublane_multiple(x.dtype) for x in inputs)

    # Lane-dense layout; rows rounded to the sublane packing multiple.
    rows = _round_up(pl.cdiv(total, 128), mult)
    yp, yt, ps, ts = (_to_lane_dense(x, rows) for x in inputs)

    tile_cap = _round_up(max(int(tile_rows), mult), mult)
    if rows <= tile_cap:
        tile, num_tiles, n_cores = rows, 1, 1          # single resident block
    else:
        tile = tile_cap
        num_tiles = pl.cdiv(rows, tile)
        n_cores = 2                                    # v7x: 2 TCs; harmless elsewhere
    steps = pl.cdiv(num_tiles, n_cores)
    need_mask = (n_cores * steps != num_tiles) or (num_tiles * tile != rows)

    if n_cores * steps == num_tiles:
        in_map = lambda c, i: (c * steps + i, 0)
    else:
        last_blk = num_tiles - 1
        # Clamp over-covering steps to an in-bounds block; the kernel masks
        # their contribution to zero.
        in_map = lambda c, i: (jnp.minimum(c * steps + i, last_blk), 0)

    in_spec = pl.BlockSpec((tile, 128), in_map)
    out_spec = pl.BlockSpec((1, 3, 8, 128), lambda c, i: (c, 0, 0, 0))

    kernel = functools.partial(_partial_sums_kernel, rows=rows, tile=tile,
                               steps=steps, need_mask=need_mask)

    partials = pl.pallas_call(
        kernel,
        out_shape=jax.ShapeDtypeStruct((n_cores, 3, 8, 128), jnp.float32),
        grid=(n_cores, steps),
        in_specs=[in_spec, in_spec, in_spec, in_spec],
        out_specs=out_spec,
        compiler_params=pltpu.CompilerParams(
            dimension_semantics=("parallel", "arbitrary")),
    )(yp, yt, ps, ts)

    # Tiny wrapper-side reduction of the per-core (8,128) partial blocks.
    sums = jnp.sum(partials, axis=(0, 2, 3))
    sum_sq, inter, denom = sums[0], sums[1], sums[2]

    mse = sum_sq / jnp.float32(total)
    dice = 1.0 - (2.0 * inter + dice_eps) / (denom + dice_eps)

    # Displacement L2 gradient smoothness on the tiny (B,2,H,W) field in
    # plain XLA (deliberate per perf review: avoids the VMEM-resident cliff).
    d = displacement.astype(jnp.float32)
    _, _, H, W = displacement.shape
    grad = jnp.float32(0.0)
    if H > 1:
        dh = d[:, :, 1:, :] - d[:, :, :-1, :]
        grad = grad + jnp.mean(dh * dh)
    if W > 1:
        dw = d[:, :, :, 1:] - d[:, :, :, :-1]
        grad = grad + jnp.mean(dw * dw)

    return (image_weight * mse + segmentation_weight * dice
            + displacement_weight * grad)


def _reference_loss(y_pred, y_true, y_pred_seg, y_true_seg, displacement,
                    image_weight=0.5, segmentation_weight=0.5,
                    displacement_weight=0.5, dice_eps=1e-5):
    yp = y_pred.astype(jnp.float32)
    yt = y_true.astype(jnp.float32)
    ps = y_pred_seg.astype(jnp.float32)
    ts = y_true_seg.astype(jnp.float32)
    d = displacement.astype(jnp.float32)
    mse = jnp.mean((yp - yt) ** 2)
    inter = jnp.sum(ps * ts)
    denom = jnp.sum(ps) + jnp.sum(ts)
    dice = 1.0 - (2.0 * inter + dice_eps) / (denom + dice_eps)
    dh = d[:, :, 1:, :] - d[:, :, :-1, :]
    dw = d[:, :, :, 1:] - d[:, :, :, :-1]
    grad = jnp.mean(dh ** 2) + jnp.mean(dw ** 2)
    return (image_weight * mse + segmentation_weight * dice
            + displacement_weight * grad)


if __name__ == "__main__":
    def make_inputs(key, B, C, H, W, img_dtype=jnp.float32):
        k1, k2, k3, k4, k5 = jax.random.split(key, 5)
        y_pred = jax.random.normal(k1, (B, C, H, W)).astype(img_dtype)
        y_true = jax.random.normal(k2, (B, C, H, W)).astype(img_dtype)
        y_pred_seg = jax.nn.softmax(jax.random.normal(k3, (B, C, H, W)), axis=1)
        y_true_seg = jax.nn.one_hot(
            jax.random.randint(k4, (B, H, W), 0, C), C, axis=-1
        ).transpose(0, 3, 1, 2).astype(jnp.float32)
        displacement = 0.1 * jax.random.normal(k5, (B, 2, H, W),
                                               dtype=jnp.float32)
        return y_pred, y_true, y_pred_seg, y_true_seg, displacement

    run = jax.jit(combined_loss, static_argnames=("tile_rows",))

    # 1) canonical small shape: single resident block, no padding, no masking.
    args = make_inputs(jax.random.PRNGKey(0), 2, 4, 16, 16)
    loss = jax.block_until_ready(run(*args))
    ref = _reference_loss(*args)
    assert jnp.allclose(loss, ref, rtol=1e-5, atol=1e-6), (loss, ref)

    # 2) same data, forced multi-tile grid with the 2-way core split
    #    (even tile count, no tail masking).
    loss2 = jax.block_until_ready(run(*args, tile_rows=8))
    assert jnp.allclose(loss2, ref, rtol=1e-5, atol=1e-6), (loss2, ref)

    # 3) ragged streaming case: odd tile count + partial last block
    #    (exercises tail-row masking and the clamped duplicate block).
    args3 = make_inputs(jax.random.PRNGKey(1), 2, 4, 32, 20)
    ref3 = _reference_loss(*args3)
    loss3 = jax.block_until_ready(run(*args3, tile_rows=16))
    assert jnp.allclose(loss3, ref3, rtol=1e-5, atol=1e-6), (loss3, ref3)
    loss3b = jax.block_until_ready(run(*args3))          # single-block path
    assert jnp.allclose(loss3b, ref3, rtol=1e-5, atol=1e-6), (loss3b, ref3)

    # 4) flattened size not a multiple of 128*sublane -> minimal zero-pad path.
    args4 = make_inputs(jax.random.PRNGKey(2), 2, 3, 16, 16)
    loss4 = jax.block_until_ready(run(*args4))
    ref4 = _reference_loss(*args4)
    assert jnp.allclose(loss4, ref4, rtol=1e-5, atol=1e-6), (loss4, ref4)

    # 5) bf16 image tensors streamed directly (kernel upcasts per tile).
    args5 = make_inputs(jax.random.PRNGKey(3), 2, 4, 16, 16,
                        img_dtype=jnp.bfloat16)
    loss5 = jax.block_until_ready(run(*args5))
    ref5 = _reference_loss(*args5)
    assert jnp.allclose(loss5, ref5, rtol=1e-4, atol=1e-5), (loss5, ref5)

    print("KERNEL_OK")
</pallas_src>

<mosaic_0001>
module attributes {stable_mosaic.version = 11 : i64} {
  func.func @_partial_sums_kernel(%arg0: i32, %arg1: i32, %arg2: memref<16x128xf32, #tpu.memory_space<vmem>>, %arg3: memref<16x128xf32, #tpu.memory_space<vmem>>, %arg4: memref<16x128xf32, #tpu.memory_space<vmem>>, %arg5: memref<16x128xf32, #tpu.memory_space<vmem>>, %arg6: memref<1x3x8x128xf32, #tpu.memory_space<vmem>>) attributes {dimension_semantics = [#tpu.dimension_semantics<parallel>, #tpu.dimension_semantics<arbitrary>], iteration_bounds = array<i64: 1, 1>, scalar_prefetch = 0 : i64, scratch_operands = 0 : i64, tpu.core_type = #tpu.core_type<tc>, window_params = [{transform_indices = @transform_0, window_bounds = array<i64: 16, 128>}, {transform_indices = @transform_1, window_bounds = array<i64: 16, 128>}, {transform_indices = @transform_2, window_bounds = array<i64: 16, 128>}, {transform_indices = @transform_3, window_bounds = array<i64: 16, 128>}, {transform_indices = @transform_4, window_bounds = array<i64: 1, 3, 8, 128>}]} {
    %c0_i32 = arith.constant 0 : i32
    %0 = arith.cmpi eq, %arg1, %c0_i32 : i32
    %1 = arith.extui %0 : i1 to i32
    %c0_i32_0 = arith.constant 0 : i32
    %2 = arith.cmpi ne, %1, %c0_i32_0 : i32
    scf.if %2 {
      %cst_32 = arith.constant 0.000000e+00 : f32
      %36 = vector.broadcast %cst_32 : f32 to vector<1x3x8x128xf32>
      %c0_33 = arith.constant 0 : index
      %c0_34 = arith.constant 0 : index
      %c0_35 = arith.constant 0 : index
      %c0_36 = arith.constant 0 : index
      %37 = vector.load %arg6[%c0_33, %c0_34, %c0_35, %c0_36] : memref<1x3x8x128xf32, #tpu.memory_space<vmem>>, vector<1x3x8x128xf32>
      tpu.vector_store %arg6[%c0_33, %c0_34, %c0_35, %c0_36], %36 {strides = array<i32>} : memref<1x3x8x128xf32, #tpu.memory_space<vmem>>, vector<1x3x8x128xf32>,
    } else {
    }
    %c0 = arith.constant 0 : index
    %c0_1 = arith.constant 0 : index
    %3 = vector.load %arg2[%c0, %c0_1] : memref<16x128xf32, #tpu.memory_space<vmem>>, vector<16x128xf32>
    %4 = vector.shape_cast %3 : vector<16x128xf32> to vector<2x8x128xf32>
    %c0_2 = arith.constant 0 : index
    %c0_3 = arith.constant 0 : index
    %5 = vector.load %arg3[%c0_2, %c0_3] : memref<16x128xf32, #tpu.memory_space<vmem>>, vector<16x128xf32>
    %6 = vector.shape_cast %5 : vector<16x128xf32> to vector<2x8x128xf32>
    %c0_4 = arith.constant 0 : index
    %c0_5 = arith.constant 0 : index
    %7 = vector.load %arg4[%c0_4, %c0_5] : memref<16x128xf32, #tpu.memory_space<vmem>>, vector<16x128xf32>
    %8 = vector.shape_cast %7 : vector<16x128xf32> to vector<2x8x128xf32>
    %c0_6 = arith.constant 0 : index
    %c0_7 = arith.constant 0 : index
    %9 = vector.load %arg5[%c0_6, %c0_7] : memref<16x128xf32, #tpu.memory_space<vmem>>, vector<16x128xf32>
    %10 = vector.shape_cast %9 : vector<16x128xf32> to vector<2x8x128xf32>
    %11 = arith.subf %4, %6 : vector<2x8x128xf32>
    %12 = arith.mulf %11, %11 : vector<2x8x128xf32>
    %13 = arith.mulf %8, %10 : vector<2x8x128xf32>
    %14 = arith.addf %8, %10 : vector<2x8x128xf32>
    %c0_8 = arith.constant 0 : index
    %c0_9 = arith.constant 0 : index
    %c0_10 = arith.constant 0 : index
    %c0_11 = arith.constant 0 : index
    %15 = vector.load %arg6[%c0_8, %c0_9, %c0_10, %c0_11] : memref<1x3x8x128xf32, #tpu.memory_space<vmem>>, vector<1x1x8x128xf32>
    %16 = vector.shape_cast %15 : vector<1x1x8x128xf32> to vector<8x128xf32>
    %cst = arith.constant dense<0.000000e+00> : vector<8x128xf32>
    %17 = vector.multi_reduction <add>, %12, %cst [0] : vector<2x8x128xf32> to vector<8x128xf32>
    %18 = arith.addf %16, %17 : vector<8x128xf32>
    %c0_12 = arith.constant 0 : index
    %c0_13 = arith.constant 0 : index
    %c0_14 = arith.constant 0 : index
    %c0_15 = arith.constant 0 : index
    %19 = vector.load %arg6[%c0_12, %c0_13, %c0_14, %c0_15] : memref<1x3x8x128xf32, #tpu.memory_space<vmem>>, vector<1x1x8x128xf32>
    %20 = vector.shape_cast %19 : vector<1x1x8x128xf32> to vector<8x128xf32>
    %21 = vector.shape_cast %18 : vector<8x128xf32> to vector<1x1x8x128xf32>
    tpu.vector_store %arg6[%c0_12, %c0_13, %c0_14, %c0_15], %21 {strides = array<i32>} : memref<1x3x8x128xf32, #tpu.memory_space<vmem>>, vector<1x1x8x128xf32>,
    %c0_16 = arith.constant 0 : index
    %c1 = arith.constant 1 : index
    %c0_17 = arith.constant 0 : index
    %c0_18 = arith.constant 0 : index
    %22 = vector.load %arg6[%c0_16, %c1, %c0_17, %c0_18] : memref<1x3x8x128xf32, #tpu.memory_space<vmem>>, vector<1x1x8x128xf32>
    %23 = vector.shape_cast %22 : vector<1x1x8x128xf32> to vector<8x128xf32>
    %cst_19 = arith.constant dense<0.000000e+00> : vector<8x128xf32>
    %24 = vector.multi_reduction <add>, %13, %cst_19 [0] : vector<2x8x128xf32> to vector<8x128xf32>
    %25 = arith.addf %23, %24 : vector<8x128xf32>
    %c0_20 = arith.constant 0 : index
    %c1_21 = arith.constant 1 : index
    %c0_22 = arith.constant 0 : index
    %c0_23 = arith.constant 0 : index
    %26 = vector.load %arg6[%c0_20, %c1_21, %c0_22, %c0_23] : memref<1x3x8x128xf32, #tpu.memory_space<vmem>>, vector<1x1x8x128xf32>
    %27 = vector.shape_cast %26 : vector<1x1x8x128xf32> to vector<8x128xf32>
    %28 = vector.shape_cast %25 : vector<8x128xf32> to vector<1x1x8x128xf32>
    tpu.vector_store %arg6[%c0_20, %c1_21, %c0_22, %c0_23], %28 {strides = array<i32>} : memref<1x3x8x128xf32, #tpu.memory_space<vmem>>, vector<1x1x8x128xf32>,
    %c0_24 = arith.constant 0 : index
    %c2 = arith.constant 2 : index
    %c0_25 = arith.constant 0 : index
    %c0_26 = arith.constant 0 : index
    %29 = vector.load %arg6[%c0_24, %c2, %c0_25, %c0_26] : memref<1x3x8x128xf32, #tpu.memory_space<vmem>>, vector<1x1x8x128xf32>
    %30 = vector.shape_cast %29 : vector<1x1x8x128xf32> to vector<8x128xf32>
    %cst_27 = arith.constant dense<0.000000e+00> : vector<8x128xf32>
    %31 = vector.multi_reduction <add>, %14, %cst_27 [0] : vector<2x8x128xf32> to vector<8x128xf32>
    %32 = arith.addf %30, %31 : vector<8x128xf32>
    %c0_28 = arith.constant 0 : index
    %c2_29 = arith.constant 2 : index
    %c0_30 = arith.constant 0 : index
    %c0_31 = arith.constant 0 : index
    %33 = vector.load %arg6[%c0_28, %c2_29, %c0_30, %c0_31] : memref<1x3x8x128xf32, #tpu.memory_space<vmem>>, vector<1x1x8x128xf32>
    %34 = vector.shape_cast %33 : vector<1x1x8x128xf32> to vector<8x128xf32>
    %35 = vector.shape_cast %32 : vector<8x128xf32> to vector<1x1x8x128xf32>
    tpu.vector_store %arg6[%c0_28, %c2_29, %c0_30, %c0_31], %35 {strides = array<i32>} : memref<1x3x8x128xf32, #tpu.memory_space<vmem>>, vector<1x1x8x128xf32>,
    return
  }
  func.func @transform_0(%arg0: i32, %arg1: i32) -> (i32, i32) {
    %c1_i32 = arith.constant 1 : i32
    %0 = arith.muli %arg0, %c1_i32 : i32
    %1 = arith.addi %0, %arg1 : i32
    %c0_i32 = arith.constant 0 : i32
    %c0_i32_0 = arith.constant 0 : i32
    return %1, %c0_i32 : i32, i32
  }
  func.func @transform_1(%arg0: i32, %arg1: i32) -> (i32, i32) {
    %c1_i32 = arith.constant 1 : i32
    %0 = arith.muli %arg0, %c1_i32 : i32
    %1 = arith.addi %0, %arg1 : i32
    %c0_i32 = arith.constant 0 : i32
    %c0_i32_0 = arith.constant 0 : i32
    return %1, %c0_i32 : i32, i32
  }
  func.func @transform_2(%arg0: i32, %arg1: i32) -> (i32, i32) {
    %c1_i32 = arith.constant 1 : i32
    %0 = arith.muli %arg0, %c1_i32 : i32
    %1 = arith.addi %0, %arg1 : i32
    %c0_i32 = arith.constant 0 : i32
    %c0_i32_0 = arith.constant 0 : i32
    return %1, %c0_i32 : i32, i32
  }
  func.func @transform_3(%arg0: i32, %arg1: i32) -> (i32, i32) {
    %c1_i32 = arith.constant 1 : i32
    %0 = arith.muli %arg0, %c1_i32 : i32
    %1 = arith.addi %0, %arg1 : i32
    %c0_i32 = arith.constant 0 : i32
    %c0_i32_0 = arith.constant 0 : i32
    return %1, %c0_i32 : i32, i32
  }
  func.func @transform_4(%arg0: i32, %arg1: i32) -> (i32, i32, i32, i32) {
    %c0_i32 = arith.constant 0 : i32
    %c0_i32_0 = arith.constant 0 : i32
    %c0_i32_1 = arith.constant 0 : i32
    %c0_i32_2 = arith.constant 0 : i32
    return %arg0, %c0_i32, %c0_i32_0, %c0_i32_1 : i32, i32, i32, i32
  }
}

</mosaic_0001>

<bundles_post_ra>
// kernel: combined_loss.1
= control target key start
LH: loop header
LB: loop body
LE: loop exit
PB: predicated region body
PF: predicated region fallthrough
CT: control target
= control target key end

     0   :  { %s233_s0 = inlined_call_operand.vmem [shape: f32[16,128], index: 0, kind: input, shape index: {}]   ;;  %s234_s1 = inlined_call_operand.vmem [shape: f32[16,128], index: 1, kind: input, shape index: {}]   ;;  %s235_s2 = inlined_call_operand.vmem [shape: f32[16,128], index: 2, kind: input, shape index: {}]   ;;  %s236_s3 = inlined_call_operand.vmem [shape: f32[16,128], index: 3, kind: input, shape index: {}]   ;;  %s237_s4 = inlined_call_operand.vmem [shape: f32[1,3,8,128], index: 4, kind: output, shape index: {}]  }
   0x1   :  { %v112_v0 = vld [vmem:[%s233_s0] sm:$0xff]  ;;  %v113_v1 = vld [vmem:[%s233_s0 + $0x8] sm:$0xff] }
   0x2   :  { %v114_v2 = vld [vmem:[%s234_s1] sm:$0xff]  ;;  %v115_v3 = vld [vmem:[%s234_s1 + $0x8] sm:$0xff] }
   0x3   :  { %v120_v4 = vsub.f32 %v112_v0, %v114_v2  ;;  %v116_v5 = vld [vmem:[%s235_s2] sm:$0xff]  ;;  %v117_v6 = vld [vmem:[%s235_s2 + $0x8] sm:$0xff]  ;;  %v121_v7 = vsub.f32 %v113_v1, %v115_v3 }
   0x4   :  { %v118_v8 = vld [vmem:[%s236_s3] sm:$0xff]  ;;  %v119_v9 = vld [vmem:[%s236_s3 + $0x8] sm:$0xff] }
   0x5   :  { %v122_v10 = vmul.f32 %v120_v4, %v120_v4  ;;  %v124_v11 = vmul.f32 %v118_v8, %v116_v5  ;;  %v125_v12 = vmul.f32 %v119_v9, %v117_v6  ;;  %v126_v13 = vadd.f32 %v118_v8, %v116_v5 }
   0x6   :  { %v123_v14 = vmul.f32 %v121_v7, %v121_v7  ;;  %v127_v15 = vadd.f32 %v119_v9, %v117_v6 }
   0x7   :  { %v134_v16 = vadd.f32 %v125_v12, %v124_v11 }
   0x8   :  { %v129_v17 = vadd.f32 %v123_v14, %v122_v10  ;;  %v139_v18 = vadd.f32 %v127_v15, %v126_v13 }
   0x9   :  { %171 = vst [vmem:[%s237_s4 + $0x8] sm:$0xff] %v134_v16 }
   0xa   :  { %131 = vst [vmem:[%s237_s4] sm:$0xff] %v129_v17  ;;  %173 = vst [vmem:[%s237_s4 + $0x10] sm:$0xff] %v139_v18 }

</bundles_post_ra>
